<compile_context>
chip_gen: v5e
topology: v5e:2x2
jax: 0.10.0
libtpu: 0.0.40
codegen_flags: <defaults>
</compile_context>

<pallas_src>
import math
import functools

import jax
import jax.numpy as jnp
from jax.experimental import pallas as pl
from jax.experimental.pallas import tpu as pltpu


def build_positional_encoding(max_len: int, d_model: int, dtype=jnp.float32):
    """Deterministic sinusoidal positional encoding, identical to the PyTorch init."""
    position = jnp.arange(0, max_len, dtype=jnp.float32)[:, None]              # [L, 1]
    div_term = jnp.exp(jnp.arange(0, d_model, 2, dtype=jnp.float32)
                       * (-math.log(10000.0) / d_model))                        # [D/2]
    pe = jnp.zeros((max_len, d_model), dtype=jnp.float32)
    pe = pe.at[:, 0::2].set(jnp.sin(position * div_term))
    pe = pe.at[:, 1::2].set(jnp.cos(position * div_term))
    return pe[None].astype(dtype)                                               # [1, L, D]


# ---------------------------------------------------------------------------
# Kernels
# ---------------------------------------------------------------------------
def _pe_add_kernel(x_ref, pe_ref, o_ref):
    # Eval-mode forward: out = x + pe  (dropout is identity in eval)
    o_ref[...] = (x_ref[...] + pe_ref[...]).astype(o_ref.dtype)


def _pe_add_dropout_kernel(x_ref, pe_ref, bits_ref, o_ref, *, drop_threshold, inv_keep):
    # Train-mode forward: inverted dropout of (x + pe).
    # keep element iff its uniform uint32 bits >= p * 2^32  (keep prob = 1 - p)
    y = x_ref[...] + pe_ref[...]
    keep = bits_ref[...] >= jnp.uint32(drop_threshold)
    o_ref[...] = jnp.where(keep, y * inv_keep, 0.0).astype(o_ref.dtype)


# ---------------------------------------------------------------------------
# Wrapper
# ---------------------------------------------------------------------------
def _pick_seq_tile(S, D, elem_bytes, target_bytes=2 * 1024 * 1024):
    """Largest sequence tile keeping a (1, TS, D) block under ~2 MiB."""
    rows = max(1, target_bytes // max(1, D * elem_bytes))
    if S <= rows:
        return S
    return max(8, (rows // 8) * 8)


def positional_encoding(x, pe_full, *, dropout_p=0.1, training=False, rng_key=None):
    """x: [B, S, D].  pe_full: [1, max_len, D].  Returns [B, S, D]."""
    B, S, D = x.shape
    _, max_len, Dp = pe_full.shape
    assert Dp == D and S <= max_len

    pe_full = pe_full.astype(x.dtype)          # avoid in-kernel dtype promotion

    ts = _pick_seq_tile(S, D, jnp.dtype(x.dtype).itemsize)
    grid = (pl.cdiv(S, ts), B)                 # seq tiles slow, batch fast

    # PE tile index is independent of the (fast) batch axis -> Pallas keeps the
    # tile resident in VMEM across consecutive grid steps (no re-DMA per batch).
    if ts % 8 == 0:
        pe_in = pe_full                        # no wrapper slice; blocks stay in-bounds
    else:
        pe_in = pe_full[:, :S, :]              # ts == S: use full-extent block on slice

    x_spec = pl.BlockSpec((1, ts, D), lambda si, b: (b, si, 0))
    pe_spec = pl.BlockSpec((1, ts, D), lambda si, b: (0, si, 0))
    o_spec = pl.BlockSpec((1, ts, D), lambda si, b: (b, si, 0))

    out_shape = jax.ShapeDtypeStruct((B, S, D), x.dtype)
    cparams = pltpu.CompilerParams(
        dimension_semantics=("parallel", "parallel"),   # megacore shard on v7x, no-op elsewhere
        vmem_limit_bytes=32 * 1024 * 1024,              # covers all double-buffered streams
    )

    if (not training) or dropout_p == 0.0:
        return pl.pallas_call(
            _pe_add_kernel,
            out_shape=out_shape,
            grid_spec=pltpu.PrefetchScalarGridSpec(
                num_scalar_prefetch=0,
                grid=grid,
                in_specs=[x_spec, pe_spec],
                out_specs=o_spec,
            ),
            compiler_params=cparams,
        )(x, pe_in)

    # Training path: dropout with inverted scaling.
    if rng_key is None:
        rng_key = jax.random.PRNGKey(0)
    bits = jax.random.bits(rng_key, (B, S, D), dtype=jnp.uint32)
    drop_threshold = min(int(round(float(dropout_p) * (2.0 ** 32))), 2 ** 32 - 1)
    inv_keep = 1.0 / (1.0 - float(dropout_p))
    bits_spec = pl.BlockSpec((1, ts, D), lambda si, b: (b, si, 0))

    return pl.pallas_call(
        functools.partial(_pe_add_dropout_kernel,
                          drop_threshold=drop_threshold, inv_keep=inv_keep),
        out_shape=out_shape,
        grid_spec=pltpu.PrefetchScalarGridSpec(
            num_scalar_prefetch=0,
            grid=grid,
            in_specs=[x_spec, pe_spec, bits_spec],
            out_specs=o_spec,
        ),
        compiler_params=cparams,
    )(x, pe_in, bits)


if __name__ == "__main__":
    B, S, D, MAX_LEN = 2, 16, 128, 64

    key = jax.random.PRNGKey(0)
    x = jax.random.normal(key, (B, S, D), dtype=jnp.float32)
    pe_full = build_positional_encoding(MAX_LEN, D)

    # Eval-mode forward (dropout is identity), deterministic.
    out = positional_encoding(x, pe_full, dropout_p=0.1, training=False)
    out = jax.block_until_ready(out)

    ref = x + pe_full[:, :S, :]
    assert jnp.allclose(out, ref, atol=1e-6), "eval-path mismatch vs reference"

    # Training path (dropout): kept elements equal ref / (1 - p); dropped are 0.
    p = 0.1
    out_train = positional_encoding(x, pe_full, dropout_p=p, training=True,
                                    rng_key=jax.random.PRNGKey(42))
    out_train = jax.block_until_ready(out_train)
    kept = out_train != 0.0
    assert jnp.allclose(jnp.where(kept, out_train, 0.0),
                        jnp.where(kept, ref / (1.0 - p), 0.0),
                        atol=1e-5), "train-path kept values mismatch"

    print("KERNEL_OK")
</pallas_src>

<mosaic_0001>
module attributes {stable_mosaic.version = 11 : i64} {
  func.func @_pe_add_kernel(%arg0: i32, %arg1: i32, %arg2: memref<1x16x128xf32, #tpu.memory_space<vmem>>, %arg3: memref<1x16x128xf32, #tpu.memory_space<vmem>>, %arg4: memref<1x16x128xf32, #tpu.memory_space<vmem>>) attributes {dimension_semantics = [#tpu.dimension_semantics<parallel>, #tpu.dimension_semantics<parallel>], iteration_bounds = array<i64: 1, 2>, scalar_prefetch = 0 : i64, scratch_operands = 0 : i64, tpu.core_type = #tpu.core_type<tc>, window_params = [{transform_indices = @transform_0, window_bounds = array<i64: 1, 16, 128>}, {transform_indices = @transform_1, window_bounds = array<i64: 1, 16, 128>}, {transform_indices = @transform_2, window_bounds = array<i64: 1, 16, 128>}]} {
    %c0 = arith.constant 0 : index
    %c0_0 = arith.constant 0 : index
    %c0_1 = arith.constant 0 : index
    %0 = vector.load %arg2[%c0, %c0_0, %c0_1] : memref<1x16x128xf32, #tpu.memory_space<vmem>>, vector<1x16x128xf32>
    %c0_2 = arith.constant 0 : index
    %c0_3 = arith.constant 0 : index
    %c0_4 = arith.constant 0 : index
    %1 = vector.load %arg3[%c0_2, %c0_3, %c0_4] : memref<1x16x128xf32, #tpu.memory_space<vmem>>, vector<1x16x128xf32>
    %2 = arith.addf %0, %1 : vector<1x16x128xf32>
    %c0_5 = arith.constant 0 : index
    %c0_6 = arith.constant 0 : index
    %c0_7 = arith.constant 0 : index
    %3 = vector.load %arg4[%c0_5, %c0_6, %c0_7] : memref<1x16x128xf32, #tpu.memory_space<vmem>>, vector<1x16x128xf32>
    tpu.vector_store %arg4[%c0_5, %c0_6, %c0_7], %2 {strides = array<i32>} : memref<1x16x128xf32, #tpu.memory_space<vmem>>, vector<1x16x128xf32>,
    return
  }
  func.func @transform_0(%arg0: i32, %arg1: i32) -> (i32, i32, i32) {
    %c0_i32 = arith.constant 0 : i32
    %c0_i32_0 = arith.constant 0 : i32
    return %arg1, %arg0, %c0_i32 : i32, i32, i32
  }
  func.func @transform_1(%arg0: i32, %arg1: i32) -> (i32, i32, i32) {
    %c0_i32 = arith.constant 0 : i32
    %c0_i32_0 = arith.constant 0 : i32
    %c0_i32_1 = arith.constant 0 : i32
    return %c0_i32, %arg0, %c0_i32_0 : i32, i32, i32
  }
  func.func @transform_2(%arg0: i32, %arg1: i32) -> (i32, i32, i32) {
    %c0_i32 = arith.constant 0 : i32
    %c0_i32_0 = arith.constant 0 : i32
    return %arg1, %arg0, %c0_i32 : i32, i32, i32
  }
}

</mosaic_0001>

<bundles_post_ra>
// kernel: tpu_custom_call.1
= control target key start
LH: loop header
LB: loop body
LE: loop exit
PB: predicated region body
PF: predicated region fallthrough
CT: control target
= control target key end

     0   :  { %7 = vsyncpa [#allocation3], 0  ;;  %s754_s0 = inlined_call_operand.hbm [shape: f32[2,16,128], index: 0, kind: input, shape index: {}]   ;;  %s755_s1 = inlined_call_operand.hbm [shape: f32[1,64,128], index: 1, kind: input, shape index: {}]   ;;  %s756_s2 = inlined_call_operand.hbm [shape: f32[2,16,128], index: 2, kind: output, shape index: {}]  }
   0x1   :  { %9 = vsyncpa [#allocation3 + $0x1], 0 }
   0x2   :  { %10 = vsyncpa [#allocation6], 0 }
   0x3   :  { %11 = vsyncpa [#allocation4], 0 }
   0x4   :  { %13 = vsyncpa [#allocation4 + $0x1], 0  ;;  %s599_s9 = smov 0   ;;  %s601_s10 = smov 0  }
   0x5   :  { %s603_s11 = smov 0   ;;  %s605_s12 = smov 0  }
   0x6   :  { %s607_s13 = smov 0   ;;  %s609_s14 = smov 0  }
   0x7 LB: > { %s335_s15 = sadd.s32 4294967295, %s577_s14   ;;  %s336_s16 = sadd.s32 4294967294, %s577_s14   ;;  %s577_s14 = sphi %s609_s14, %s19_s14   ;;  %s573_s13 = sphi %s607_s13, %s768_s13   ;;  %s569_s12 = sphi %s605_s12, %s767_s12   ;;  %s565_s11 = sphi %s603_s11, %s766_s11   ;;  %s561_s10 = sphi %s601_s10, %s765_s10   ;;  %s557_s9 = sphi %s599_s9, %s764_s9  }
   0x8   : > { %p53_p0 = scmp.ne.s32.totalorder %s561_s10, %s557_s9  ;;  %p633_p1 = scmp.eq.s32.totalorder %s335_s15, 0 }
   0x9   : > { %p637_p2 = scmp.eq.s32.totalorder %s335_s15, 1  ;;  %p111_p3 = scmp.eq.s32.totalorder %s336_s16, 1 }
   0xa   : > { %p643_p4 = por %p633_p1, %p53_p0  ;;  %p337_p5 = scmp.ge.s32.totalorder %s577_s14, 1 }
   0xb   : > { %p648_p6 = por %p111_p3, %p53_p0  ;;  %p118_p7 = scmp.lt.s32.totalorder %s577_s14, 3 }
   0xc   : > { %s132_s23 = sshll.u32 %s755_s1, 4  ;;  %s579_s25 = smov [#allocation5]   ;;  %s133_s23 = int_to_ptr.hbm [resolvable:$true] %s132_s23 }
   0xd   : > { %p656_p8 = pnand %p337_p5, %p118_p7  ;;  %s134_s26 = sshll.u32 %s579_s25, 4  ;;  %s135_s26 = int_to_ptr.vmem [resolvable:$true] %s134_s26 }
   0xe   : > { %p339_p11 = scmp.ge.s32.totalorder %s577_s14, 2  ;;  %s580_s27 = smov 128  }
   0xf   : > { %p362_p9 = pneg %p656_p8  ;;  %s581_s28 = smov 8  }
  0x10   : > { %s28_s29 = sadd.s32 1, %s573_s13  ;;  %s40_s30 = sadd.s32 1, %s565_s11 }
  0x11   : > { %p363_p10 = pnand %p362_p9, %p633_p1  ;;  %p29_p12 = scmp.ge.s32.totalorder %s28_s29, 2 }
  0x12   : > { %p47_p13 = scmp.ne.s32.totalorder %s565_s11, %s561_s10  ;;  %p48_p0 = scmp.eq.s32.totalorder %s577_s14, 0 }
  0x13   : > { %365 = dma.hbm_to_vmem [thread:$0]  (!%p363_p10), %s133_s23, 256, %s135_s26, [#allocation6], %s580_s27, %s580_s27, %s581_s28  }
  0x14   : > { %s770_s29 = smov (%p29_p12, %s28_s29), 0  ;;  %p675_p3 = por %p48_p0, %p47_p13 }
  0x15   : > { %p681_p5 = por %p637_p2, %p47_p13  ;;  %s35_s5 = ssub.s32 %s573_s13, %s770_s29 }
  0x16   : > { %p375_p7 = scmp.lt.s32.totalorder %s577_s14, 2  ;;  %p38_p9 = scmp.eq.s32.totalorder %s35_s5, 0 }
  0x17   : > { %s148_s6 = sand.u32 1, %s565_s11   ;;  %s352_s15 = sshll.u32 %s573_s13, 4 }
  0x18   : > { %s340_s7 = sshll.u32 %s148_s6, 4  ;;  %s159_s22 = scalar_lea.hbm %s754_s0, %s352_s15 }
  0x19   : > { %s690_s8 = scalar_select %p38_p9, %s565_s11, %s40_s30  }
  0x1a   : > { %s152_s23 = scalar_lea.vmem [#allocation2], %s340_s7  ;;  %s160_s18 = sshll.u32 %s159_s22, 4  ;;  %s161_s18 = int_to_ptr.hbm [resolvable:$true] %s160_s18 }
  0x1b   : > { %s162_s25 = sshll.u32 %s152_s23, 4  ;;  %p367_p2 = pnand %p375_p7, %p675_p3  ;;  %s163_s25 = int_to_ptr.vmem [resolvable:$true] %s162_s25 }
  0x1c   : > { %s149_s26 = scalar_lea.sflag [#allocation3], %s148_s6  ;;  %174 = sbr.rel (%p656_p8) target bundleno = 52 (0x34), region = 28 }
  0x1d   : > { %369 = dma.hbm_to_vmem [thread:$0]  (!%p367_p2), %s161_s18, 256, %s163_s25, %s149_s26, %s580_s27, %s580_s27, %s581_s28  }
  0x1e   : > { %s704_s30 = sand.u32 (!%p656_p8), 1, %s561_s10  }
  0x1f   : > { %s344_s5 = sshll.u32 (!%p656_p8), %s704_s30, 4  ;;  %s177_s7 = scalar_lea.sflag (!%p656_p8), [#allocation3], %s704_s30 }
  0x20   : > { %s180_s15 = scalar_lea.vmem (!%p656_p8), [#allocation2], %s344_s5 }
  0x21   : > { %544 = dma.done.wait (%p643_p4), %s177_s7, 256  }
  0x22   : > { %546 = vsyncadd (%p643_p4), %s177_s7, 4294967040 }
  0x23   : > { %548 = dma.done.wait (%p633_p1), [#allocation6], 256  }
  0x24   : > { %550 = vsyncadd (%p633_p1), [#allocation6], 4294967040  ;;  %s353_s24 = sshll.u32 %s569_s12, 4  ;;  %s206_s6 = scalar_lea.vmem [#allocation7], %s344_s5  ;;  %v210_v0 = vld [vmem:[%s180_s15] sm:$0xff]  ;;  %v211_v2 = vld [vmem:[%s180_s15 + $0x8] sm:$0xff] }
  0x25   : > { %s232_s3 = scalar_lea.hbm %s756_s2, %s353_s24  ;;  %s233_s16 = sshll.u32 %s206_s6, 4  ;;  %v212_v1 = vld [vmem:[#allocation5] sm:$0xff]  ;;  %v213_v4 = vld [vmem:[#allocation5 + $0x8] sm:$0xff]  ;;  %s234_s16 = int_to_ptr.vmem [resolvable:$true] %s233_s16 }
  0x26   : > { %s235_s21 = sshll.u32 %s232_s3, 4  ;;  %v214_v3 = vadd.f32 %v212_v1, %v210_v0  ;;  %v215_v5 = vadd.f32 %v213_v4, %v211_v2  ;;  %s219_s17 = scalar_lea.sflag [#allocation4], %s704_s30  ;;  %s236_s21 = int_to_ptr.hbm [resolvable:$true] %s235_s21 }
  0x27   : > { %s505_s12 = sshra.s32 %s236_s21, 4  ;;  %s511_s25 = scalar_lea.hbm %s756_s2, 32  ;;  %s506_s12 = int_to_ptr.hbm [resolvable:$true] %s505_s12 }
  0x28   : > { %216 = vst [vmem:[%s206_s6] sm:$0xff] %v214_v3  ;;  %s507_s19 = scalar_lea.hbm %s506_s12, 16  ;;  %p512_p10 = scmp.lt.s32.totalorder %s506_s12, %s756_s2 }
  0x29   : > { %217 = vst [vmem:[%s206_s6 + $0x8] sm:$0xff] %v215_v5  ;;  %p508_p1 = scmp.ne.s32.totalorder %s506_s12, %s507_s19  ;;  %p513_p12 = scmp.lt.s32.totalorder %s511_s25, %s507_s19 }
  0x2b   : > { %p509_p4 = pnand %p508_p1, %p681_p5  ;;  %p514_p13 = por %p513_p12, %p512_p10 }
  0x2d   : > { %p510_p8 = pneg %p509_p4 }
  0x2f   : > { %p515_p0 = pnand %p514_p13, %p510_p8 }
  0x31   : > { %518 = shalt.err (!%p515_p0)
}
  0x32   : > { %s582_s30 = smov 128   ;;  %s583_s5 = smov 8  }
  0x33   : > { %360 = dma.vmem_to_hbm [thread:$0]  (%p681_p5), %s234_s16, 256, %s236_s21, %s219_s17, %s582_s30, %s582_s30, %s583_s5  }
  0x34 PF: > { %s250_s7 = sand.u32 1, %s557_s9   ;;  %p371_p3 = pnand %p339_p11, %p648_p6 }
  0x35   : > { %s251_s15 = scalar_lea.sflag [#allocation4], %s250_s7 }
  0x36   : > { %p372_p7 = pneg %p371_p3 }
  0x38   : > { %552 = dma.done.wait (%p372_p7), %s251_s15, 256  }
  0x39   : > { %554 = vsyncadd (%p372_p7), %s251_s15, 4294967040  ;;  %s19_s14 = sadd.s32 1, %s577_s14   ;;  %s764_s9 = smov %s561_s10 }
  0x3a   : > { %p16_p9 = scmp.ge.s32.totalorder %s19_s14, 4   ;;  %s765_s10 = smov %s565_s11 }
  0x3b   : > { %s766_s11 = smov %s690_s8  ;;  %s767_s12 = smov %s573_s13 }
  0x3c   : > { %s768_s13 = smov %s770_s29  ;;  %18 = sbr.rel (!%p16_p9) target bundleno = 7 (0x7), region = 78 }
  0x41   :  { %257 = vsyncpa [#allocation3], 1 }
  0x42   :  { %259 = vsyncpa [#allocation3 + $0x1], 1 }
  0x43   :  { %260 = vsyncpa [#allocation6], 1 }
  0x44   :  { %261 = vsyncpa [#allocation4], 1 }
  0x45   :  { %263 = vsyncpa [#allocation4 + $0x1], 1 }

</bundles_post_ra>
